<compile_context>
chip_gen: v7x
topology: tpu7x:2x2x1
jax: 0.10.0
libtpu: 0.0.40
codegen_flags: <defaults>
</compile_context>

<pallas_src>
import functools

import jax
import jax.numpy as jnp
from jax.experimental import pallas as pl
from jax.experimental.pallas import tpu as pltpu


def _round_up(x, m):
    return ((x + m - 1) // m) * m


def _fc_softmax_kernel(x_ref, w_ref, b_ref, o_ref):
    # x_ref: (TB, 512) f32, w_ref: (512, C_pad) bf16 (resident), b_ref: (1, C_pad) f32,
    # o_ref: (TB, C_pad) f32.
    x_bf = x_ref[...].astype(jnp.bfloat16)  # in-kernel cast: hides under MXU/DMA slack
    logits = jnp.dot(x_bf, w_ref[...],
                     preferred_element_type=jnp.float32) + b_ref[...]
    # Numerically stable softmax over the class (lane) dim, all in f32.
    # Padded classes have bias = -1e30 (f32!) -> exp underflows to exactly 0, so they
    # contribute nothing to the denominator and get probability 0.
    m = jnp.max(logits, axis=-1, keepdims=True)
    e = jnp.exp(logits - m)
    denom = jnp.sum(e, axis=-1, keepdims=True)
    # Exact divide (NOT pl.reciprocal(approx=True)): keeps row sums == 1 to f32
    # precision; this kernel is DMA/launch-bound so the VPU divide is free.
    o_ref[...] = (e / denom).astype(o_ref.dtype)


def prepare_fc_params(weight, bias):
    """One-time parameter prep (hoisted out of the per-call path).

    weight: [num_classes, 512] f32 (PyTorch nn.Linear layout), bias: [num_classes] f32.
    Returns (w_bf, b_pad): [512, C_pad] bf16 and [1, C_pad] f32 with C_pad a multiple
    of 128. Padded class columns are zero in W and carry a -1e30 bias so they end up
    with exactly zero softmax probability.
    """
    C, D = weight.shape
    C_pad = _round_up(max(C, 128), 128)
    w_t = jnp.transpose(weight)                                   # [D, C]
    w_pad = jnp.zeros((D, C_pad), weight.dtype).at[:, :C].set(w_t)
    w_bf = w_pad.astype(jnp.bfloat16)
    b_pad = jnp.full((1, C_pad), -1e30, dtype=jnp.float32)
    b_pad = b_pad.at[0, :C].set(bias.astype(jnp.float32))
    return w_bf, b_pad


@functools.partial(jax.jit, static_argnames=("num_classes", "tb_max"))
def mynet_forward(x, w_bf, b_pad, *, num_classes, tb_max=512):
    """x: [B, 512] f32; w_bf/b_pad from prepare_fc_params.

    Returns softmax(x @ W^T + b) over the class dim, shape [B, num_classes], f32.
    """
    B, D = x.shape
    C_pad = w_bf.shape[1]

    # Batch tiling: TB multiple of 8 sublanes, capped at tb_max (big tiles amortize
    # the ~0.35us per-grid-step overhead; W stays resident across steps).
    TB = min(tb_max, _round_up(B, 8))
    B_pad = _round_up(B, TB)
    x_pad = x if B_pad == B else jnp.zeros((B_pad, D), x.dtype).at[:B].set(x)

    grid = (B_pad // TB,)
    cost = pl.CostEstimate(
        flops=2 * B_pad * D * C_pad,
        transcendentals=B_pad * C_pad,
        bytes_accessed=4 * B_pad * D + 2 * D * C_pad
        + 4 * (C_pad + B_pad * C_pad),
    )

    out = pl.pallas_call(
        _fc_softmax_kernel,
        out_shape=jax.ShapeDtypeStruct((B_pad, C_pad), jnp.float32),
        grid_spec=pl.GridSpec(
            grid=grid,
            in_specs=[
                pl.BlockSpec((TB, D), lambda i: (i, 0)),       # x: tiled over batch
                pl.BlockSpec((D, C_pad), lambda i: (0, 0)),    # W: resident in VMEM
                pl.BlockSpec((1, C_pad), lambda i: (0, 0)),    # b: resident in VMEM
            ],
            out_specs=pl.BlockSpec((TB, C_pad), lambda i: (i, 0)),
        ),
        compiler_params=pltpu.CompilerParams(
            dimension_semantics=("parallel",)),                # 2 TCs on v7x when grid>1
        cost_estimate=cost,
    )(x_pad, w_bf, b_pad)

    # Slice padded batch rows / padded classes back off.
    return out[:B, :num_classes]


if __name__ == "__main__":
    num_classes = 65
    batch = 8
    in_features = 512  # fixed by nn.Linear(512, num_classes)

    key = jax.random.PRNGKey(0)
    kx, kw, kb = jax.random.split(key, 3)

    x = jax.random.normal(kx, (batch, in_features), dtype=jnp.float32)
    # PyTorch nn.Linear stores weight as [out_features, in_features].
    bound = 1.0 / (in_features ** 0.5)
    weight = jax.random.uniform(kw, (num_classes, in_features),
                                minval=-bound, maxval=bound, dtype=jnp.float32)
    bias = jax.random.uniform(kb, (num_classes,),
                              minval=-bound, maxval=bound, dtype=jnp.float32)

    # One-time parameter prep (outside the per-call path).
    w_bf, b_pad = prepare_fc_params(weight, bias)

    out = mynet_forward(x, w_bf, b_pad, num_classes=num_classes)
    out = jax.block_until_ready(out)

    # Pure-JAX f32 reference (bf16 matmul in the kernel => modest tolerance).
    ref = jax.nn.softmax(x @ weight.T + bias, axis=1)

    assert out.shape == (batch, num_classes)
    assert bool(jnp.allclose(jnp.sum(out, axis=1), 1.0, atol=1e-3))
    assert bool(jnp.allclose(out, ref, atol=5e-3))

    print("KERNEL_OK")
</pallas_src>

<mosaic_0001>
module attributes {stable_mosaic.version = 11 : i64} {
  func.func @_fc_softmax_kernel(%arg0: i32, %arg1: memref<8x512xf32, #tpu.memory_space<vmem>>, %arg2: memref<512x128xbf16, #tpu.memory_space<vmem>>, %arg3: memref<1x128xf32, #tpu.memory_space<vmem>>, %arg4: memref<8x128xf32, #tpu.memory_space<vmem>>) attributes {dimension_semantics = [#tpu.dimension_semantics<parallel>], iteration_bounds = array<i64: 1>, scalar_prefetch = 0 : i64, scratch_operands = 0 : i64, tpu.core_type = #tpu.core_type<tc>, window_params = [{transform_indices = @transform_0, window_bounds = array<i64: 8, 512>}, {pipeline_mode = #tpu.pipeline_mode<synchronous>, transform_indices = @transform_1, window_bounds = array<i64: 512, 128>}, {pipeline_mode = #tpu.pipeline_mode<synchronous>, transform_indices = @transform_2, window_bounds = array<i64: 1, 128>}, {transform_indices = @transform_3, window_bounds = array<i64: 8, 128>}]} {
    %c0 = arith.constant 0 : index
    %c0_0 = arith.constant 0 : index
    %0 = vector.load %arg1[%c0, %c0_0] : memref<8x512xf32, #tpu.memory_space<vmem>>, vector<8x512xf32>
    %1 = arith.truncf %0 : vector<8x512xf32> to vector<8x512xbf16>
    %c0_1 = arith.constant 0 : index
    %c0_2 = arith.constant 0 : index
    %2 = vector.load %arg2[%c0_1, %c0_2] : memref<512x128xbf16, #tpu.memory_space<vmem>>, vector<512x128xbf16>
    %cst = arith.constant dense<0.000000e+00> : vector<8x128xf32>
    %3 = tpu.matmul %1, %2, %cst {dimension_numbers = #tpu.dot_dimension_numbers<[1], [0], [0], [1], [0, 0, 1, 1], [], []>} : vector<8x512xbf16>, vector<512x128xbf16>, vector<8x128xf32> -> vector<8x128xf32>
    %c0_3 = arith.constant 0 : index
    %c0_4 = arith.constant 0 : index
    %4 = vector.load %arg3[%c0_3, %c0_4] : memref<1x128xf32, #tpu.memory_space<vmem>>, vector<1x128xf32>
    %5 = vector.broadcast %4 : vector<1x128xf32> to vector<8x128xf32>
    %6 = arith.addf %3, %5 : vector<8x128xf32>
    %cst_5 = arith.constant dense<0xFF800000> : vector<8xf32>
    %7 = vector.multi_reduction <maximumf>, %6, %cst_5 [1] : vector<8x128xf32> to vector<8xf32>
    %8 = vector.shape_cast %7 : vector<8xf32> to vector<8x1xf32>
    %9 = vector.broadcast %8 : vector<8x1xf32> to vector<8x128xf32>
    %10 = arith.subf %6, %9 : vector<8x128xf32>
    %11 = math.exp %10 : vector<8x128xf32>
    %cst_6 = arith.constant dense<0.000000e+00> : vector<8xf32>
    %12 = vector.multi_reduction <add>, %11, %cst_6 [1] : vector<8x128xf32> to vector<8xf32>
    %13 = vector.shape_cast %12 : vector<8xf32> to vector<8x1xf32>
    %14 = vector.broadcast %13 : vector<8x1xf32> to vector<8x128xf32>
    %15 = arith.divf %11, %14 : vector<8x128xf32>
    %c0_7 = arith.constant 0 : index
    %c0_8 = arith.constant 0 : index
    %16 = vector.load %arg4[%c0_7, %c0_8] : memref<8x128xf32, #tpu.memory_space<vmem>>, vector<8x128xf32>
    tpu.vector_store %arg4[%c0_7, %c0_8], %15 {strides = array<i32>} : memref<8x128xf32, #tpu.memory_space<vmem>>, vector<8x128xf32>,
    return
  }
  func.func @transform_0(%arg0: i32) -> (i32, i32) {
    %c0_i32 = arith.constant 0 : i32
    %c0_i32_0 = arith.constant 0 : i32
    return %arg0, %c0_i32 : i32, i32
  }
  func.func @transform_1(%arg0: i32) -> (i32, i32) {
    %c0_i32 = arith.constant 0 : i32
    %c0_i32_0 = arith.constant 0 : i32
    %c0_i32_1 = arith.constant 0 : i32
    return %c0_i32, %c0_i32_0 : i32, i32
  }
  func.func @transform_2(%arg0: i32) -> (i32, i32) {
    %c0_i32 = arith.constant 0 : i32
    %c0_i32_0 = arith.constant 0 : i32
    %c0_i32_1 = arith.constant 0 : i32
    return %c0_i32, %c0_i32_0 : i32, i32
  }
  func.func @transform_3(%arg0: i32) -> (i32, i32) {
    %c0_i32 = arith.constant 0 : i32
    %c0_i32_0 = arith.constant 0 : i32
    return %arg0, %c0_i32 : i32, i32
  }
}

</mosaic_0001>

<bundles_post_ra>
// kernel: mynet_forward.1
= control target key start
LH: loop header
LB: loop body
LE: loop exit
PB: predicated region body
PF: predicated region fallthrough
CT: control target
= control target key end

     0   :  { %8 = vsyncpa [#allocation3], 0  ;;  %s680_s0 = inlined_call_operand.hbm [shape: f32[8,512], index: 0, kind: input, shape index: {}]   ;;  %s681_s1 = inlined_call_operand.hbm [shape: bf16[512,128], index: 1, kind: input, shape index: {}]   ;;  %s682_s2 = inlined_call_operand.vmem [shape: f32[1,128], index: 2, kind: input, shape index: {}]   ;;  %s683_s3 = inlined_call_operand.hbm [shape: f32[8,128], index: 3, kind: output, shape index: {}]  }
   0x1   :  { %9 = vsyncpa [#allocation6], 0 }
   0x2   :  { %10 = vsyncpa [#allocation4], 0  ;;  %s609_s12 = smov [#allocation2]   ;;  %s610_s14 = smov [#allocation5]  }
   0x3   :  { %s17_s13 = sshll.u32 %s609_s12, 4  ;;  %s26_s15 = sshll.u32 %s610_s14, 4  ;;  %s18_s13 = int_to_ptr.vmem [resolvable:$true] %s17_s13  ;;  %s634_s15 = int_to_ptr.vmem [resolvable:$true] %s26_s15 }
   0x4   :  { %s537_s18 = scalar_lea.hbm %s680_s0, 512 }
   0x5   :  { %p538_p0 = scmp.ne.s32.totalorder %s680_s0, %s537_s18  ;;  %p541_p1 = scmp.lt.u32.totalorder %s537_s18, %s680_s0 }
   0x7   :  { %p543_p2 = pnand %p541_p1, %p538_p0 }
   0x9   :  { %546 = shalt.err (!%p543_p2)
}
   0xa   :  { %s547_s23 = scalar_lea.vmem %s18_s13, 512  ;;  %p552_p4 = scmp.lt.s32.totalorder %s18_s13, %s18_s13 }
   0xb   :  { %p548_p3 = scmp.ne.s32.totalorder %s18_s13, %s547_s23  ;;  %p553_p5 = scmp.lt.s32.totalorder %s547_s23, %s547_s23 }
   0xd   :  { %p554_p6 = por %p553_p5, %p552_p4 }
   0xf   :  { %p555_p7 = pnand %p554_p6, %p548_p3 }
  0x11   :  { %558 = shalt.err (!%p555_p7)
}
  0x12   :  { %20 = dma.hbm_to_vmem [thread:$0]  %s680_s0, 512, %s18_s13, [#allocation3]  }
  0x13   :  { %s559_s28 = scalar_lea.hbm %s681_s1, 4096 }
  0x14   :  { %p560_p8 = scmp.ne.s32.totalorder %s681_s1, %s559_s28  ;;  %p563_p9 = scmp.lt.u32.totalorder %s559_s28, %s681_s1 }
  0x16   :  { %p565_p10 = pnand %p563_p9, %p560_p8 }
  0x18   :  { %568 = shalt.err (!%p565_p10)
}
  0x19   :  { %s569_s6 = scalar_lea.vmem %s634_s15, 4096  ;;  %p574_p12 = scmp.lt.s32.totalorder %s634_s15, %s634_s15 }
  0x1a   :  { %p570_p11 = scmp.ne.s32.totalorder %s634_s15, %s569_s6  ;;  %p575_p13 = scmp.lt.s32.totalorder %s569_s6, %s569_s6 }
  0x1c   :  { %p576_p0 = por %p575_p13, %p574_p12 }
  0x1e   :  { %p577_p1 = pnand %p576_p0, %p570_p11 }
  0x20   :  { %580 = shalt.err (!%p577_p1)
}
  0x21   :  { %s611_s0 = smov 64   ;;  %s612_s7 = smov 4  }
  0x22   :  { %32 = dma.hbm_to_vmem [thread:$0]  %s681_s1, 4096, %s634_s15, [#allocation6], %s611_s0, %s611_s0, %s612_s7  }
  0x23   :  { %603 = dma.done.wait [#allocation3], 512  }
  0x24   :  { %604 = vsyncadd [#allocation3], 4294966784 }
  0x25   :  { %605 = dma.done.wait [#allocation6], 4096  }
  0x26   :  { %606 = vsyncadd [#allocation6], 4294963200  ;;  %v501_v0 = vld [vmem:[#allocation5 + $0x40] sm:$0xff]   ;;  %v505_v4 = vld [vmem:[#allocation5 + $0x48] sm:$0xff]  }
  0x27   :  { %v502_v1 = vld [vmem:[#allocation5 + $0xc0] sm:$0xff]   ;;  %452 = vmatprep.subr.bf16.mxu0 %v501_v0  ;;  %v506_v5 = vld [vmem:[#allocation5 + $0xc8] sm:$0xff]   ;;  %v509_v8 = vld [vmem:[#allocation5 + $0x50] sm:$0xff]  }
  0x28   :  { %v503_v2 = vld [vmem:[#allocation5] sm:$0xff]   ;;  %474 = vmatprep.subr.bf16.mxu1 %v502_v1  ;;  %v507_v6 = vld [vmem:[#allocation5 + $0x8] sm:$0xff]   ;;  %v510_v9 = vld [vmem:[#allocation5 + $0xd0] sm:$0xff]  }
  0x29   :  { %v504_v3 = vld [vmem:[#allocation5 + $0x80] sm:$0xff]   ;;  %453 = vmatpush3.bf16.msra.mxu0 %v503_v2  ;;  %v508_v7 = vld [vmem:[#allocation5 + $0x88] sm:$0xff]   ;;  %v511_v10 = vld [vmem:[#allocation5 + $0x10] sm:$0xff]  }
  0x2a   :  { %475 = vmatpush3.bf16.msra.mxu1 %v504_v3  ;;  %454 = vmatprep.subr.bf16.mxu0 %v505_v4  ;;  %v512_v11 = vld [vmem:[#allocation5 + $0x90] sm:$0xff]   ;;  %v513_v12 = vld [vmem:[#allocation5 + $0x58] sm:$0xff]   ;;  %v517_v16 = vld [vmem:[#allocation5 + $0x60] sm:$0xff]  }
  0x2b   :  { %476 = vmatprep.subr.bf16.mxu1 %v506_v5  ;;  %v514_v13 = vld [vmem:[#allocation5 + $0xd8] sm:$0xff]   ;;  %v518_v17 = vld [vmem:[#allocation5 + $0xe0] sm:$0xff]   ;;  %v521_v20 = vld [vmem:[#allocation5 + $0x68] sm:$0xff]  }
  0x2c   :  { %v515_v14 = vld [vmem:[#allocation5 + $0x18] sm:$0xff]   ;;  %v519_v18 = vld [vmem:[#allocation5 + $0x20] sm:$0xff]   ;;  %v522_v21 = vld [vmem:[#allocation5 + $0xe8] sm:$0xff]  }
  0x2d   :  { %455 = vmatpush3.bf16.msra.mxu0 %v507_v6  ;;  %v516_v15 = vld [vmem:[#allocation5 + $0x98] sm:$0xff]   ;;  %v520_v19 = vld [vmem:[#allocation5 + $0xa0] sm:$0xff]   ;;  %v523_v22 = vld [vmem:[#allocation5 + $0x28] sm:$0xff]  }
  0x2e   :  { %477 = vmatpush3.bf16.msra.mxu1 %v508_v7  ;;  %456 = vmatprep.subr.bf16.mxu0 %v509_v8  ;;  %v524_v23 = vld [vmem:[#allocation5 + $0xa8] sm:$0xff]   ;;  %v525_v24 = vld [vmem:[#allocation5 + $0x70] sm:$0xff]   ;;  %v529_v28 = vld [vmem:[#allocation5 + $0x78] sm:$0xff]  }
  0x2f   :  { %478 = vmatprep.subr.bf16.mxu1 %v510_v9  ;;  %v526_v25 = vld [vmem:[#allocation5 + $0xf0] sm:$0xff]   ;;  %v530_v29 = vld [vmem:[#allocation5 + $0xf8] sm:$0xff]   ;;  %v43_v32 = vld [vmem:[#allocation2 + $0x8] sm:$0xff] }
  0x30   :  { %v527_v26 = vld [vmem:[#allocation5 + $0x30] sm:$0xff]   ;;  %v531_v30 = vld [vmem:[#allocation5 + $0x38] sm:$0xff]   ;;  %v42_v34 = vld [vmem:[#allocation2] sm:$0xff]  ;;  %v47_v35 = vpack.c.bf16 %v43_v32, %v43_v32 }
  0x31   :  { %457 = vmatpush3.bf16.msra.mxu0 %v511_v10  ;;  %v528_v27 = vld [vmem:[#allocation5 + $0xb0] sm:$0xff]   ;;  %v532_v31 = vld [vmem:[#allocation5 + $0xb8] sm:$0xff]   ;;  %v46_v37 = vpack.c.bf16 %v42_v34, %v42_v34  ;;  %v419_v42 = vld [vmem:[%s682_s2] ss:$0 sm:$0xff]  ;;  %s613_s2 = smov [#allocation7]  }
  0x32   :  { %479 = vmatpush3.bf16.msra.mxu1 %v512_v11  ;;  %458 = vmatprep.subr.bf16.mxu0 %v513_v12  ;;  %v45_v33 = vld [vmem:[#allocation2 + $0x18] sm:$0xff]  ;;  %v44_v38 = vld [vmem:[#allocation2 + $0x10] sm:$0xff]  ;;  %s409_s11 = sshll.u32 %s613_s2, 4  ;;  %s410_s11 = int_to_ptr.vmem [resolvable:$true] %s409_s11 }
  0x33   :  { %480 = vmatprep.subr.bf16.mxu1 %v514_v13  ;;  %v49_v36 = vpack.c.bf16 %v45_v33, %v45_v33  ;;  %v48_v39 = vpack.c.bf16 %v44_v38, %v44_v38  ;;  %345 = vmatprep.mubr.bf16.mxu0 %v47_v35  ;;  %s581_s12 = scalar_lea.vmem %s410_s11, 128  ;;  %p586_p3 = scmp.lt.s32.totalorder %s410_s11, %s410_s11 }
  0x34   :  { %p582_p2 = scmp.ne.s32.totalorder %s410_s11, %s581_s12  ;;  %p587_p4 = scmp.lt.s32.totalorder %s581_s12, %s581_s12 }
  0x35   :  { %459 = vmatpush3.bf16.msra.mxu0 %v515_v14  ;;  %385 = vmatprep.mubr.bf16.mxu1 %v49_v36 }
  0x36   :  { %481 = vmatpush3.bf16.msra.mxu1 %v516_v15  ;;  %460 = vmatprep.subr.bf16.mxu0 %v517_v16  ;;  %p588_p5 = por %p587_p4, %p586_p3 }
  0x37   :  { %482 = vmatprep.subr.bf16.mxu1 %v518_v17 }
  0x38   :  { %p589_p6 = pnand %p588_p5, %p582_p2 }
  0x39   :  { %461 = vmatpush3.bf16.msra.mxu0 %v519_v18 }
  0x3a   :  { %483 = vmatpush3.bf16.msra.mxu1 %v520_v19  ;;  %462 = vmatprep.subr.bf16.mxu0 %v521_v20 }
  0x3b   :  { %484 = vmatprep.subr.bf16.mxu1 %v522_v21 }
  0x3d   :  { %463 = vmatpush3.bf16.msra.mxu0 %v523_v22 }
  0x3e   :  { %485 = vmatpush3.bf16.msra.mxu1 %v524_v23  ;;  %464 = vmatprep.subr.bf16.mxu0 %v525_v24 }
  0x3f   :  { %486 = vmatprep.subr.bf16.mxu1 %v526_v25 }
  0x41   :  { %465 = vmatpush3.bf16.msra.mxu0 %v527_v26 }
  0x42   :  { %487 = vmatpush3.bf16.msra.mxu1 %v528_v27  ;;  %466 = vmatprep.subr.bf16.mxu0 %v529_v28 }
  0x43   :  { %488 = vmatprep.subr.bf16.mxu1 %v530_v29 }
  0x45   :  { %467 = vmatpush3.bf16.msra.mxu0 %v531_v30 }
  0x46   :  { %489 = vmatpush3.bf16.msra.mxu1 %v532_v31 }
  0x48   :  { %346 = vmatmul.mubr.bf16.vlgmr.msra.gmra.mrb[0].mxu0 %v46_v37 }
  0x49   :  { %386 = vmatmul.mubr.bf16.vlgmr.msra.gmra.mrb[0].mxu1 %v48_v39 }
 0x11b   :  { %v468_v40 = vpop.f32.mrb[0].mxu0 }
 0x11c   :  { %v490_v41 = vpop.f32.mrb[0].mxu1  ;;  %v469_v43 = vpop.f32.mrb[1].mxu0 }
 0x11d   :  { %v491_v44 = vpop.f32.mrb[1].mxu1  ;;  %v470_v45 = vadd.f32 %v469_v43, %v468_v40  ;;  %v471_v47 = vpop.f32.mrb[2].mxu0 }
 0x11e   :  { %v492_v46 = vadd.f32 %v491_v44, %v490_v41  ;;  %v493_v48 = vpop.f32.mrb[2].mxu1  ;;  %v472_v49 = vpop.f32.mrb[3].mxu0 }
 0x11f   :  { %v494_v50 = vpop.f32.mrb[3].mxu1  ;;  %v348_v51 = vadd.f32 %v470_v45, %v419_v42 }
 0x121   :  { %v388_v52 = vadd.f32 %v492_v46, %v348_v51 }
 0x123   :  { %393 = vmax.xlane.f32.xlu0 %v388_v52 }
 0x1b0   :  { %v394_v53 = vpop.xlane.xlu0 %393 }
 0x1b1   :  { %v395_v54 = vsub.f32 %v388_v52, %v394_v53 }
 0x1b3   :  { %v396_v55 = vmul.f32 1.442695, %v395_v54 }
 0x1b5   :  { %533 = vpow2.f32 %v396_v55 }
 0x1bf   :  { %v534_v56 = vpop.eup %533 }
 0x1c0   :  { %398 = vadd.xlane.f32.xlu0 %v534_v56 }
 0x24d   :  { %v399_v57 = vpop.xlane.xlu0 %398 }
 0x24e   :  { %535 = vrcp.f32 %v399_v57 }
 0x258   :  { %v536_v58 = vpop.eup %535 }
 0x259   :  { %v401_v59 = vmul.f32 %v536_v58, %v534_v56 }
 0x25b   :  { %402 = vst [vmem:[#allocation7] sm:$0xff] %v401_v59 }
 0x25c   :  { %592 = shalt.err (!%p589_p6)
}
 0x25d   :  { %s593_s15 = scalar_lea.hbm %s683_s3, 128 }
 0x25e   :  { %p594_p7 = scmp.ne.s32.totalorder %s683_s3, %s593_s15  ;;  %p597_p8 = scmp.lt.u32.totalorder %s593_s15, %s683_s3 }
 0x260   :  { %p599_p9 = pnand %p597_p8, %p594_p7 }
 0x262   :  { %602 = shalt.err (!%p599_p9)
}
 0x263   :  { %412 = dma.vmem_to_hbm [thread:$0]  %s410_s11, 128, %s683_s3, [#allocation4]  }
 0x264   :  { %607 = dma.done.wait [#allocation4], 128  }
 0x265   :  { %608 = vsyncadd [#allocation4], 4294967168 }
 0x266   :  { %416 = vsyncpa [#allocation3], 1 }
 0x267   :  { %417 = vsyncpa [#allocation6], 1 }
 0x268   :  { %418 = vsyncpa [#allocation4], 1 }

</bundles_post_ra>
